<compile_context>
chip_gen: v7x
topology: tpu7x:2x2x1
jax: 0.10.0
libtpu: 0.0.40
codegen_flags: <defaults>
</compile_context>

<pallas_src>
import functools

import jax
import jax.numpy as jnp
from jax.experimental import pallas as pl
from jax.experimental.pallas import tpu as pltpu


def _round_up(v, m):
    return (v + m - 1) // m * m


def _vmem_capacity_bytes():
    try:
        return int(pltpu.get_tpu_info().vmem_capacity_bytes)
    except Exception:
        return 64 * 1024 * 1024  # conservative: v7x per-TC VMEM


# --------------------------- fused single-pass kernel ---------------------------

def _se_fused_kernel(x_ref, w1t_ref, b1_ref, w2_ref, b2_ref, o_ref, *, inv_hw):
    # x_ref : (1, C, HWp)  one batch element, (padded) HW on the lane axis
    # w1t   : (C, Cr)      fc1 weight, transposed from PyTorch (Cr, C)
    # b1    : (1, Cr);  w2: (C, Cr) native PyTorch layout;  b2: (C, 1)
    xb = x_ref[0]                                                     # native dtype

    # ---- squeeze: per-channel mean (f32 accumulation, no full f32 copy kept) ----
    s = jnp.sum(xb.astype(jnp.float32), axis=-1, keepdims=True) * inv_hw   # (C, 1)

    # ---- excitation layer 1: relu(W1 @ s + b1) via broadcast + sublane reduce ----
    h = jnp.sum(w1t_ref[...].astype(jnp.float32) * s, axis=0, keepdims=True)
    h = jnp.maximum(h + b1_ref[...].astype(jnp.float32), 0.0)              # (1, Cr)

    # ---- excitation layer 2: sigmoid(W2 @ h + b2) via broadcast + lane reduce ----
    g = jnp.sum(w2_ref[...].astype(jnp.float32) * h, axis=1, keepdims=True)
    g = jax.nn.sigmoid(g + b2_ref[...].astype(jnp.float32))                # (C, 1)

    # ---- scale: native-dtype multiply (halves VALU work for bf16 on v6e/v7x) ----
    o_ref[0] = xb * g.astype(o_ref.dtype)


# --------------------------- two-pass fallback kernels --------------------------

def _pool_excite_kernel(x_ref, w1t_ref, b1_ref, w2_ref, b2_ref, g_ref, acc_ref,
                        *, inv_hw):
    t = pl.program_id(1)

    @pl.when(t == 0)
    def _():
        acc_ref[...] = jnp.zeros_like(acc_ref)

    acc_ref[...] += jnp.sum(x_ref[0].astype(jnp.float32), axis=-1, keepdims=True)

    @pl.when(t == pl.num_programs(1) - 1)
    def _():
        s = acc_ref[...] * inv_hw                                           # (C, 1)
        h = jnp.sum(w1t_ref[...].astype(jnp.float32) * s, axis=0, keepdims=True)
        h = jnp.maximum(h + b1_ref[...].astype(jnp.float32), 0.0)           # (1, Cr)
        g = jnp.sum(w2_ref[...].astype(jnp.float32) * h, axis=1, keepdims=True)
        g_ref[0] = jax.nn.sigmoid(g + b2_ref[...].astype(jnp.float32))      # (C, 1)


def _scale_kernel(g_ref, x_ref, o_ref):
    o_ref[0] = x_ref[0] * g_ref[0].astype(o_ref.dtype)


# ------------------------------------ wrapper -----------------------------------

@jax.jit
def se_block(x, fc1_w, fc1_b, fc2_w, fc2_b):
    """SEBlock.forward.  x: (N, C, H, W); fc1_w: (Cr, C); fc2_w: (C, Cr)."""
    n, c, h, w = x.shape
    hw = h * w
    cr = fc1_w.shape[0]
    itemsize = x.dtype.itemsize
    inv_hw = 1.0 / float(hw)

    w1t = fc1_w.T                         # (C, Cr)
    b1 = fc1_b.reshape(1, cr)
    b2 = fc2_b.reshape(c, 1)
    weight_bytes = (2 * c * cr + cr + c) * 4

    vmem_cap = _vmem_capacity_bytes()
    headroom = 2 << 20

    x_flat = x.reshape(n, c, hw)          # free reshape, NCHW is contiguous

    # Fused-path budget: double-buffered in+out blocks + f32 reduce temp + weights.
    hw_fused = _round_up(hw, 128)         # lane-dense stores (unmasked vst)
    blk = c * hw_fused * itemsize
    fused_needed = 4 * blk + c * hw_fused * 4 + 2 * weight_bytes + headroom

    if fused_needed <= (vmem_cap * 3) // 4:
        # -------------------- single fused pallas_call --------------------
        if hw_fused != hw:
            x_flat = jnp.pad(x_flat, ((0, 0), (0, 0), (0, hw_fused - hw)))
        out_flat = pl.pallas_call(
            functools.partial(_se_fused_kernel, inv_hw=inv_hw),
            out_shape=jax.ShapeDtypeStruct((n, c, hw_fused), x.dtype),
            grid=(n,),
            in_specs=[
                pl.BlockSpec((1, c, hw_fused), lambda i: (i, 0, 0)),  # x plane
                pl.BlockSpec((c, cr), lambda i: (0, 0)),              # w1t (resident)
                pl.BlockSpec((1, cr), lambda i: (0, 0)),              # b1
                pl.BlockSpec((c, cr), lambda i: (0, 0)),              # w2
                pl.BlockSpec((c, 1), lambda i: (0, 0)),               # b2
            ],
            out_specs=pl.BlockSpec((1, c, hw_fused), lambda i: (i, 0, 0)),
            compiler_params=pltpu.CompilerParams(
                dimension_semantics=("parallel",),
                vmem_limit_bytes=min(max(fused_needed, 16 << 20), vmem_cap),
            ),
            cost_estimate=pl.CostEstimate(
                flops=2 * n * c * hw + 4 * n * c * cr,
                transcendentals=n * c,
                bytes_accessed=2 * n * c * hw * itemsize + weight_bytes,
            ),
        )(x_flat, w1t, b1, fc2_w, b2)
    else:
        # ---------- two-pass: pool+excite, then tiled channel rescale ----------
        # Spatial tile: lane-dense (multiple of 128), ~2 MiB per x block.
        target = 2 << 20
        hw_tile = max(128, ((target // (c * itemsize)) // 128) * 128)
        hw_tile = min(hw_tile, _round_up(hw, 128))
        hw_p = _round_up(hw, hw_tile)
        n_t = hw_p // hw_tile
        if hw_p != hw:
            x_flat = jnp.pad(x_flat, ((0, 0), (0, 0), (0, hw_p - hw)))

        pool_needed = (4 * c * hw_tile * itemsize + c * hw_tile * 4
                       + 2 * weight_bytes + headroom)
        gates = pl.pallas_call(
            functools.partial(_pool_excite_kernel, inv_hw=inv_hw),
            out_shape=jax.ShapeDtypeStruct((n, c, 1), jnp.float32),
            grid=(n, n_t),
            in_specs=[
                pl.BlockSpec((1, c, hw_tile), lambda i, t: (i, 0, t)),
                pl.BlockSpec((c, cr), lambda i, t: (0, 0)),
                pl.BlockSpec((1, cr), lambda i, t: (0, 0)),
                pl.BlockSpec((c, cr), lambda i, t: (0, 0)),
                pl.BlockSpec((c, 1), lambda i, t: (0, 0)),
            ],
            out_specs=pl.BlockSpec((1, c, 1), lambda i, t: (i, 0, 0)),
            scratch_shapes=[pltpu.VMEM((c, 1), jnp.float32)],
            compiler_params=pltpu.CompilerParams(
                dimension_semantics=("parallel", "arbitrary"),
                vmem_limit_bytes=min(max(pool_needed, 16 << 20), vmem_cap),
            ),
            cost_estimate=pl.CostEstimate(
                flops=n * c * hw + 4 * n * c * cr,
                transcendentals=n * c,
                bytes_accessed=n * c * hw * itemsize + weight_bytes,
            ),
        )(x_flat, w1t, b1, fc2_w, b2)

        scale_needed = 4 * c * hw_tile * itemsize + headroom
        out_flat = pl.pallas_call(
            _scale_kernel,
            out_shape=jax.ShapeDtypeStruct((n, c, hw_p), x.dtype),
            grid=(n, n_t),
            in_specs=[
                pl.BlockSpec((1, c, 1), lambda i, t: (i, 0, 0)),       # gate
                pl.BlockSpec((1, c, hw_tile), lambda i, t: (i, 0, t)),  # x tile
            ],
            out_specs=pl.BlockSpec((1, c, hw_tile), lambda i, t: (i, 0, t)),
            compiler_params=pltpu.CompilerParams(
                dimension_semantics=("parallel", "parallel"),
                vmem_limit_bytes=min(max(scale_needed, 16 << 20), vmem_cap),
            ),
            cost_estimate=pl.CostEstimate(
                flops=n * c * hw,
                transcendentals=0,
                bytes_accessed=2 * n * c * hw * itemsize,
            ),
        )(gates, x_flat)

    # TODO(synk): if the caller never reuses x, input_output_aliases={0: 0} on the
    # scale/fused call would save one HBM output allocation in the outer graph.
    if out_flat.shape[-1] != hw:
        out_flat = out_flat[..., :hw]
    return out_flat.reshape(n, c, h, w)


def _reference_se(x, fc1_w, fc1_b, fc2_w, fc2_b):
    """Pure-JAX SEBlock reference (matches PyTorch semantics)."""
    s = jnp.mean(x.astype(jnp.float32), axis=(2, 3))              # (N, C)
    h = jnp.maximum(s @ fc1_w.T + fc1_b, 0.0)                     # (N, Cr)
    g = jax.nn.sigmoid(h @ fc2_w.T + fc2_b)                       # (N, C)
    return (x.astype(jnp.float32) * g[:, :, None, None]).astype(x.dtype)


if __name__ == "__main__":
    key = jax.random.PRNGKey(0)
    k_x, k_w1, k_b1, k_w2, k_b2 = jax.random.split(key, 5)

    N, C, H, W = 2, 64, 16, 16
    REDUCTION = 16
    CR = C // REDUCTION

    x = jax.random.normal(k_x, (N, C, H, W), dtype=jnp.float32)
    fc1_w = jax.random.normal(k_w1, (CR, C), dtype=jnp.float32) * 0.1
    fc1_b = jax.random.normal(k_b1, (CR,), dtype=jnp.float32) * 0.1
    fc2_w = jax.random.normal(k_w2, (C, CR), dtype=jnp.float32) * 0.1
    fc2_b = jax.random.normal(k_b2, (C,), dtype=jnp.float32) * 0.1

    out = se_block(x, fc1_w, fc1_b, fc2_w, fc2_b)
    out = jax.block_until_ready(out)

    assert out.shape == (N, C, H, W), out.shape
    ref = _reference_se(x, fc1_w, fc1_b, fc2_w, fc2_b)
    if not jnp.allclose(out, ref, atol=1e-5, rtol=1e-5):
        max_err = jnp.max(jnp.abs(out - ref))
        raise AssertionError(f"Pallas SEBlock mismatch vs reference (max err {max_err})")

    print("KERNEL_OK")
</pallas_src>

<mosaic_0001>
module attributes {stable_mosaic.version = 11 : i64} {
  func.func @_se_fused_kernel(%arg0: i32, %arg1: memref<1x64x256xf32, #tpu.memory_space<vmem>>, %arg2: memref<64x4xf32, #tpu.memory_space<vmem>>, %arg3: memref<1x4xf32, #tpu.memory_space<vmem>>, %arg4: memref<64x4xf32, #tpu.memory_space<vmem>>, %arg5: memref<64x1xf32, #tpu.memory_space<vmem>>, %arg6: memref<1x64x256xf32, #tpu.memory_space<vmem>>) attributes {dimension_semantics = [#tpu.dimension_semantics<parallel>], iteration_bounds = array<i64: 2>, scalar_prefetch = 0 : i64, scratch_operands = 0 : i64, tpu.core_type = #tpu.core_type<tc>, window_params = [{transform_indices = @transform_0, window_bounds = array<i64: 1, 64, 256>}, {pipeline_mode = #tpu.pipeline_mode<synchronous>, transform_indices = @transform_1, window_bounds = array<i64: 64, 4>}, {pipeline_mode = #tpu.pipeline_mode<synchronous>, transform_indices = @transform_2, window_bounds = array<i64: 1, 4>}, {pipeline_mode = #tpu.pipeline_mode<synchronous>, transform_indices = @transform_3, window_bounds = array<i64: 64, 4>}, {pipeline_mode = #tpu.pipeline_mode<synchronous>, transform_indices = @transform_4, window_bounds = array<i64: 64, 1>}, {transform_indices = @transform_5, window_bounds = array<i64: 1, 64, 256>}]} {
    %c0 = arith.constant 0 : index
    %c0_0 = arith.constant 0 : index
    %c0_1 = arith.constant 0 : index
    %0 = vector.load %arg1[%c0, %c0_0, %c0_1] : memref<1x64x256xf32, #tpu.memory_space<vmem>>, vector<1x64x256xf32>
    %1 = vector.shape_cast %0 : vector<1x64x256xf32> to vector<64x256xf32>
    %cst = arith.constant dense<0.000000e+00> : vector<64xf32>
    %2 = vector.multi_reduction <add>, %1, %cst [1] : vector<64x256xf32> to vector<64xf32>
    %3 = vector.shape_cast %2 : vector<64xf32> to vector<64x1xf32>
    %cst_2 = arith.constant 3.906250e-03 : f32
    %4 = vector.broadcast %cst_2 : f32 to vector<64x1xf32>
    %5 = arith.mulf %3, %4 : vector<64x1xf32>
    %c0_3 = arith.constant 0 : index
    %c0_4 = arith.constant 0 : index
    %6 = vector.load %arg2[%c0_3, %c0_4] : memref<64x4xf32, #tpu.memory_space<vmem>>, vector<64x4xf32>
    %7 = vector.broadcast %5 : vector<64x1xf32> to vector<64x4xf32>
    %8 = arith.mulf %6, %7 : vector<64x4xf32>
    %cst_5 = arith.constant dense<0.000000e+00> : vector<4xf32>
    %9 = vector.multi_reduction <add>, %8, %cst_5 [0] : vector<64x4xf32> to vector<4xf32>
    %10 = vector.shape_cast %9 : vector<4xf32> to vector<1x4xf32>
    %c0_6 = arith.constant 0 : index
    %c0_7 = arith.constant 0 : index
    %11 = vector.load %arg3[%c0_6, %c0_7] : memref<1x4xf32, #tpu.memory_space<vmem>>, vector<1x4xf32>
    %12 = arith.addf %10, %11 : vector<1x4xf32>
    %cst_8 = arith.constant 0.000000e+00 : f32
    %13 = vector.broadcast %cst_8 : f32 to vector<1x4xf32>
    %14 = arith.maximumf %12, %13 : vector<1x4xf32>
    %c0_9 = arith.constant 0 : index
    %c0_10 = arith.constant 0 : index
    %15 = vector.load %arg4[%c0_9, %c0_10] : memref<64x4xf32, #tpu.memory_space<vmem>>, vector<64x4xf32>
    %16 = vector.broadcast %14 : vector<1x4xf32> to vector<64x4xf32>
    %17 = arith.mulf %15, %16 : vector<64x4xf32>
    %cst_11 = arith.constant dense<0.000000e+00> : vector<64xf32>
    %18 = vector.multi_reduction <add>, %17, %cst_11 [1] : vector<64x4xf32> to vector<64xf32>
    %19 = vector.shape_cast %18 : vector<64xf32> to vector<64x1xf32>
    %c0_12 = arith.constant 0 : index
    %c0_13 = arith.constant 0 : index
    %20 = vector.load %arg5[%c0_12, %c0_13] : memref<64x1xf32, #tpu.memory_space<vmem>>, vector<64x1xf32>
    %21 = arith.addf %19, %20 : vector<64x1xf32>
    %22 = arith.negf %21 : vector<64x1xf32>
    %23 = math.exp %22 : vector<64x1xf32>
    %cst_14 = arith.constant 1.000000e+00 : f32
    %24 = vector.broadcast %cst_14 : f32 to vector<64x1xf32>
    %25 = arith.addf %24, %23 : vector<64x1xf32>
    %26 = arith.divf %24, %25 : vector<64x1xf32>
    %27 = vector.broadcast %26 : vector<64x1xf32> to vector<64x256xf32>
    %28 = arith.mulf %1, %27 : vector<64x256xf32>
    %c0_15 = arith.constant 0 : index
    %c0_16 = arith.constant 0 : index
    %c0_17 = arith.constant 0 : index
    %29 = vector.load %arg6[%c0_15, %c0_16, %c0_17] : memref<1x64x256xf32, #tpu.memory_space<vmem>>, vector<1x64x256xf32>
    %30 = vector.shape_cast %29 : vector<1x64x256xf32> to vector<64x256xf32>
    %31 = vector.shape_cast %28 : vector<64x256xf32> to vector<1x64x256xf32>
    tpu.vector_store %arg6[%c0_15, %c0_16, %c0_17], %31 {strides = array<i32>} : memref<1x64x256xf32, #tpu.memory_space<vmem>>, vector<1x64x256xf32>,
    return
  }
  func.func @transform_0(%arg0: i32) -> (i32, i32, i32) {
    %c0_i32 = arith.constant 0 : i32
    %c0_i32_0 = arith.constant 0 : i32
    %c0_i32_1 = arith.constant 0 : i32
    return %arg0, %c0_i32, %c0_i32_0 : i32, i32, i32
  }
  func.func @transform_1(%arg0: i32) -> (i32, i32) {
    %c0_i32 = arith.constant 0 : i32
    %c0_i32_0 = arith.constant 0 : i32
    %c0_i32_1 = arith.constant 0 : i32
    return %c0_i32, %c0_i32_0 : i32, i32
  }
  func.func @transform_2(%arg0: i32) -> (i32, i32) {
    %c0_i32 = arith.constant 0 : i32
    %c0_i32_0 = arith.constant 0 : i32
    %c0_i32_1 = arith.constant 0 : i32
    return %c0_i32, %c0_i32_0 : i32, i32
  }
  func.func @transform_3(%arg0: i32) -> (i32, i32) {
    %c0_i32 = arith.constant 0 : i32
    %c0_i32_0 = arith.constant 0 : i32
    %c0_i32_1 = arith.constant 0 : i32
    return %c0_i32, %c0_i32_0 : i32, i32
  }
  func.func @transform_4(%arg0: i32) -> (i32, i32) {
    %c0_i32 = arith.constant 0 : i32
    %c0_i32_0 = arith.constant 0 : i32
    %c0_i32_1 = arith.constant 0 : i32
    return %c0_i32, %c0_i32_0 : i32, i32
  }
  func.func @transform_5(%arg0: i32) -> (i32, i32, i32) {
    %c0_i32 = arith.constant 0 : i32
    %c0_i32_0 = arith.constant 0 : i32
    %c0_i32_1 = arith.constant 0 : i32
    return %arg0, %c0_i32, %c0_i32_0 : i32, i32, i32
  }
}

</mosaic_0001>

<bundles_post_ra>
// kernel: se_block.1
= control target key start
LH: loop header
LB: loop body
LE: loop exit
PB: predicated region body
PF: predicated region fallthrough
CT: control target
= control target key end

     0   :  { %s652_s18 = smov 0   ;;  %s849_s0 = inlined_call_operand.vmem [shape: f32[2,64,256], index: 0, kind: input, shape index: {}]   ;;  %s850_s1 = inlined_call_operand.vmem [shape: f32[64,4], index: 1, kind: input, shape index: {}]   ;;  %s851_s2 = inlined_call_operand.vmem [shape: f32[1,4], index: 2, kind: input, shape index: {}]   ;;  %s852_s3 = inlined_call_operand.vmem [shape: f32[64,4], index: 3, kind: input, shape index: {}]   ;;  %s853_s4 = inlined_call_operand.vmem [shape: f32[64,1], index: 4, kind: input, shape index: {}]   ;;  %s854_s5 = inlined_call_operand.vmem [shape: f32[2,64,256], index: 5, kind: output, shape index: {}]  }
   0x1 LB: > { %s549_s19 = sadd.s32 4294967295, %s619_s18   ;;  %p553_p0 = scmp.ge.s32.totalorder %s619_s18, 1  ;;  %s619_s18 = sphi %s652_s18, %s15_s18  }
   0x2   : > { %p187_p1 = scmp.lt.s32.totalorder %s619_s18, 3 }
   0x4   : > { %p188_p2 = pnand %p553_p0, %p187_p1 }
   0x5   : > { %p215_p3 = scmp.lt.s32.totalorder (!%p188_p2), %s549_s19, 1  ;;  %v273_v27 = vld [vmem:[%s850_s1] sm:$0xff] (!%p188_p2)  ;;  %v275_v29 = vld [vmem:[%s850_s1 + $0x10] sm:$0xff] (!%p188_p2)  ;;  %v274_v30 = vld [vmem:[%s850_s1 + $0x8] sm:$0xff] (!%p188_p2)  ;;  %vm289_vm0 = vcmask (!%p188_p2), 31744  }
   0x6   : > { %191 = sbr.rel (%p188_p2) target bundleno = 531 (0x213), region = 40  ;;  %v276_v34 = vld [vmem:[%s850_s1 + $0x18] sm:$0xff] (!%p188_p2)  ;;  %v277_v40 = vld [vmem:[%s850_s1 + $0x20] sm:$0xff] (!%p188_p2)  ;;  %v278_v45 = vld [vmem:[%s850_s1 + $0x28] sm:$0xff] (!%p188_p2) }
   0x7   : > { %v279_v54 = vld [vmem:[%s850_s1 + $0x30] sm:$0xff] (!%p188_p2)  ;;  %v280_v58 = vld [vmem:[%s850_s1 + $0x38] sm:$0xff] (!%p188_p2) }
   0xd   : > { %s856_s19 = smov (!%p215_p3, %s549_s19), 1 }
   0xe   : > { %s568_s20 = sshll.u32 %s856_s19, 7 }
   0xf   : > { %s219_s23 = scalar_lea.vmem %s849_s0, %s568_s20  ;;  %s812_s7 = scalar_lea.vmem %s854_s5, %s568_s20 }
  0x10   : > { %v668_v0 = vld [vmem:[%s219_s23] sm:$0xff]  ;;  %v670_v1 = vld [vmem:[%s219_s23 + $0x8] sm:$0xff]  ;;  %v678_v5 = vld [vmem:[%s219_s23 + $0x10] sm:$0xff] }
  0x11   : > { %v672_v2 = vld [vmem:[%s219_s23 + $0x20] sm:$0xff]  ;;  %v241_v3 = vadd.f32 %v670_v1, %v668_v0  ;;  %v676_v4 = vld [vmem:[%s219_s23 + $0x28] sm:$0xff]  ;;  %v680_v6 = vld [vmem:[%s219_s23 + $0x18] sm:$0xff] }
  0x12   : > { %v247_v7 = vadd.f32 %v676_v4, %v672_v2  ;;  %v684_v8 = vld [vmem:[%s219_s23 + $0x30] sm:$0xff]  ;;  %v686_v9 = vld [vmem:[%s219_s23 + $0x38] sm:$0xff]  ;;  %v244_v10 = vadd.f32 %v680_v6, %v678_v5  ;;  %v692_v12 = vld [vmem:[%s219_s23 + $0x40] sm:$0xff] }
  0x13   : > { %242 = vadd.xlane.f32.xlu0 %v241_v3  ;;  %v250_v11 = vadd.f32 %v686_v9, %v684_v8  ;;  %v694_v13 = vld [vmem:[%s219_s23 + $0x48] sm:$0xff]  ;;  %v696_v14 = vld [vmem:[%s219_s23 + $0x50] sm:$0xff]  ;;  %v698_v15 = vld [vmem:[%s219_s23 + $0x58] sm:$0xff] }
  0x14   : > { %248 = vadd.xlane.f32.xlu1 %v247_v7  ;;  %v253_v16 = vadd.f32 %v694_v13, %v692_v12  ;;  %v256_v17 = vadd.f32 %v698_v15, %v696_v14  ;;  %v704_v18 = vld [vmem:[%s219_s23 + $0x60] sm:$0xff]  ;;  %v706_v19 = vld [vmem:[%s219_s23 + $0x68] sm:$0xff]  ;;  %v708_v20 = vld [vmem:[%s219_s23 + $0x70] sm:$0xff] }
  0x15   : > { %v710_v21 = vld [vmem:[%s219_s23 + $0x78] sm:$0xff]  ;;  %v259_v22 = vadd.f32 %v706_v19, %v704_v18 }
  0x16   : > { %v262_v23 = vadd.f32 %v710_v21, %v708_v20 }
  0x17   : > { %245 = vadd.xlane.f32.xlu0 %v244_v10 }
  0x18   : > { %251 = vadd.xlane.f32.xlu1 %v250_v11 }
  0x1b   : > { %254 = vadd.xlane.f32.xlu0 %v253_v16 }
  0x1c   : > { %257 = vadd.xlane.f32.xlu1 %v256_v17 }
  0x1f   : > { %260 = vadd.xlane.f32.xlu0 %v259_v22 }
  0x20   : > { %263 = vadd.xlane.f32.xlu1 %v262_v23 }
  0xa0   : > { %v243_v24 = vpop.xlane.xlu0 %242 }
  0xa1   : > { %v265_v25 = vmul.f32 0.00390625, %v243_v24  ;;  %v249_v26 = vpop.xlane.xlu1 %248 }
  0xa2   : > { %v267_v28 = vmul.f32 0.00390625, %v249_v26 }
  0xa3   : > { %v281_v32 = vmul.f32 %v273_v27, %v265_v25  ;;  %v322_v25 = vlaneseq }
  0xa4   : > { %v246_v31 = vpop.xlane.xlu0 %245  ;;  %v283_v37 = vmul.f32 %v275_v29, %v267_v28 }
  0xa5   : > { %v266_v33 = vmul.f32 0.00390625, %v246_v31  ;;  %v252_v35 = vpop.xlane.xlu1 %251  ;;  %v290_v42 = vsel %vm289_vm0, %v281_v32, 0.0  ;;  %v323_v28 = vshrl.u32 %v322_v25, 7 }
  0xa6   : > { %v268_v36 = vmul.f32 0.00390625, %v252_v35  ;;  %v293_v49 = vsel %vm289_vm0, %v283_v37, 0.0  ;;  %v315_v35 = vld [vmem:[%s852_s3 + $0x8] sm:$0xff] }
  0xa7   : > { %v282_v38 = vmul.f32 %v274_v30, %v266_v33  ;;  %v311_v30 = vld [vmem:[%s851_s2] sm:$0x1]  ;;  %v324_v32 = vsub.s32 0, %v323_v28 }
  0xa8   : > { %v284_v39 = vmul.f32 %v276_v34, %v268_v36  ;;  %v255_v41 = vpop.xlane.xlu0 %254  ;;  %v314_v36 = vld [vmem:[%s852_s3] sm:$0xff] }
  0xa9   : > { %v291_v43 = vsel %vm289_vm0, %v282_v38, 0.0  ;;  %v269_v44 = vmul.f32 0.00390625, %v255_v41  ;;  %v258_v46 = vpop.xlane.xlu1 %257  ;;  %v317_v38 = vld [vmem:[%s852_s3 + $0x18] sm:$0xff]  ;;  %v362_v28 = vld [vmem:[%s853_s4 + $0x20] sm:$0xff] }
  0xaa   : > { %v292_v47 = vadd.f32 %v291_v43, %v290_v42  ;;  %v270_v48 = vmul.f32 0.00390625, %v258_v46  ;;  %v295_v50 = vsel %vm289_vm0, %v284_v39, 0.0  ;;  %v316_v39 = vld [vmem:[%s852_s3 + $0x10] sm:$0xff]  ;;  %v319_v46 = vld [vmem:[%s852_s3 + $0x28] sm:$0xff] }
  0xab   : > { %v285_v51 = vmul.f32 %v277_v40, %v269_v44 }
  0xac   : > { %v294_v52 = vadd.f32 %v293_v49, %v292_v47  ;;  %v286_v53 = vmul.f32 %v278_v45, %v270_v48  ;;  %v261_v55 = vpop.xlane.xlu0 %260  ;;  %v318_v47 = vld [vmem:[%s852_s3 + $0x20] sm:$0xff] }
  0xad   : > { %v297_v56 = vsel %vm289_vm0, %v285_v51, 0.0  ;;  %v271_v57 = vmul.f32 0.00390625, %v261_v55  ;;  %v264_v59 = vpop.xlane.xlu1 %263 }
  0xae   : > { %v296_v60 = vadd.f32 %v295_v50, %v294_v52  ;;  %v272_v61 = vmul.f32 0.00390625, %v264_v59  ;;  %v299_v62 = vsel %vm289_vm0, %v286_v53, 0.0  ;;  %v321_v52 = vld [vmem:[%s852_s3 + $0x38] sm:$0xff]  ;;  %v320_v53 = vld [vmem:[%s852_s3 + $0x30] sm:$0xff] }
  0xaf   : > { %v287_v63 = vmul.f32 %v279_v54, %v271_v57 }
  0xb0   : > { %v298_v3 = vadd.f32 %v297_v56, %v296_v60  ;;  %v288_v7 = vmul.f32 %v280_v58, %v272_v61  ;;  %v621_v60 = vmov 0   ;;  %v359_v61 = vld [vmem:[%s853_s4 + $0x8] sm:$0xff] }
  0xb1   : > { %v301_v10 = vsel %vm289_vm0, %v287_v63, 0.0  ;;  %580 = vset.pattern.permute.xlu1 %v621_v60  ;;  %579 = vset.pattern.permute.xlu0 %v621_v60 }
  0xb2   : > { %v300_v11 = vadd.f32 %v299_v62, %v298_v3  ;;  %v303_v16 = vsel %vm289_vm0, %v288_v7, 0.0  ;;  %v358_v62 = vld [vmem:[%s853_s4] sm:$0xff] }
  0xb4   : > { %v302_v17 = vadd.f32 %v301_v10, %v300_v11  ;;  %v361_v11 = vld [vmem:[%s853_s4 + $0x18] sm:$0xff] }
  0xb6   : > { %v304_v22 = vadd.f32 %v303_v16, %v302_v17  ;;  %v360_v16 = vld [vmem:[%s853_s4 + $0x10] sm:$0xff] }
  0xb8   : > { %v305_v23 = vrot.slane %v304_v22, 4 }
  0xba   : > { %v306_v24 = vadd.f32 %v305_v23, %v304_v22 }
  0xbc   : > { %v307_v26 = vrot.slane %v306_v24, 2 }
  0xbe   : > { %v308_v27 = vadd.f32 %v307_v26, %v306_v24 }
  0xc0   : > { %v309_v29 = vrot.slane %v308_v27, 1 }
  0xc2   : > { %v310_v31 = vadd.f32 %v309_v29, %v308_v27  ;;  %v363_v27 = vld [vmem:[%s853_s4 + $0x28] sm:$0xff] }
  0xc4   : > { %v312_v33 = vadd.f32 %v311_v30, %v310_v31 }
  0xc6   : > { %v313_v34 = vmax.f32 %v312_v33, 0.0 }
  0xc8   : > { %v325_v37 = vrot.slane %v313_v34, %v324_v32 }
  0xca   : > { %v327_v40 = vmul.f32 %v325_v37, %v315_v35  ;;  %v326_v41 = vmul.f32 %v325_v37, %v314_v36  ;;  %v329_v44 = vmul.f32 %v325_v37, %v317_v38  ;;  %v328_v45 = vmul.f32 %v325_v37, %v316_v39  ;;  %v364_v36 = vld [vmem:[%s853_s4 + $0x30] sm:$0xff] }
  0xcb   : > { %v331_v50 = vmul.f32 %v325_v37, %v319_v46  ;;  %v330_v51 = vmul.f32 %v325_v37, %v318_v47  ;;  %v333_v56 = vmul.f32 %v325_v37, %v321_v52  ;;  %v332_v57 = vmul.f32 %v325_v37, %v320_v53 }
  0xcc   : > { %v337_v42 = vsel %vm289_vm0, %v327_v40, 0.0  ;;  %v334_v43 = vsel %vm289_vm0, %v326_v41, 0.0  ;;  %v343_v48 = vsel %vm289_vm0, %v329_v44, 0.0  ;;  %v340_v49 = vsel %vm289_vm0, %v328_v45, 0.0  ;;  %v365_v41 = vld [vmem:[%s853_s4 + $0x38] sm:$0xff] }
  0xcd   : > { %338 = vadd.xlane.f32.xlu1 %v337_v42  ;;  %335 = vadd.xlane.f32.xlu0 %v334_v43  ;;  %v349_v54 = vsel %vm289_vm0, %v331_v50, 0.0  ;;  %v346_v55 = vsel %vm289_vm0, %v330_v51, 0.0  ;;  %v355_v58 = vsel %vm289_vm0, %v333_v56, 0.0  ;;  %v352_v59 = vsel %vm289_vm0, %v332_v57, 0.0 }
  0xd1   : > { %344 = vadd.xlane.f32.xlu1 %v343_v48  ;;  %341 = vadd.xlane.f32.xlu0 %v340_v49 }
  0xd5   : > { %350 = vadd.xlane.f32.xlu1 %v349_v54  ;;  %347 = vadd.xlane.f32.xlu0 %v346_v55 }
  0xd9   : > { %356 = vadd.xlane.f32.xlu1 %v355_v58  ;;  %353 = vadd.xlane.f32.xlu0 %v352_v59 }
 0x15a   : > { %v339_v63 = vpop.xlane.xlu1 %338  ;;  %v336_v3 = vpop.xlane.xlu0 %335 }
 0x15b   : > { %v367_v7 = vadd.f32 %v359_v61, %v339_v63  ;;  %v366_v10 = vadd.f32 %v358_v62, %v336_v3 }
 0x15d   : > { %v559_v17 = vmul.f32 -1.442695, %v367_v7  ;;  %v558_v22 = vmul.f32 -1.442695, %v366_v10 }
 0x15e   : > { %v345_v23 = vpop.xlane.xlu1 %344  ;;  %v342_v24 = vpop.xlane.xlu0 %341 }
 0x15f   : > { %581 = vpow2.f32 %v559_v17  ;;  %v369_v25 = vadd.f32 %v361_v11, %v345_v23  ;;  %v368_v26 = vadd.f32 %v360_v16, %v342_v24 }
 0x160   : > { %583 = vpow2.f32 %v558_v22 }
 0x161   : > { %v561_v29 = vmul.f32 -1.442695, %v369_v25  ;;  %v560_v30 = vmul.f32 -1.442695, %v368_v26 }
 0x162   : > { %v351_v31 = vpop.xlane.xlu1 %350  ;;  %v348_v32 = vpop.xlane.xlu0 %347 }
 0x163   : > { %585 = vpow2.f32 %v561_v29  ;;  %v371_v33 = vadd.f32 %v363_v27, %v351_v31  ;;  %v370_v34 = vadd.f32 %v362_v28, %v348_v32 }
 0x164   : > { %587 = vpow2.f32 %v560_v30 }
 0x165   : > { %v562_v35 = vmul.f32 -1.442695, %v370_v34  ;;  %v563_v38 = vmul.f32 -1.442695, %v371_v33 }
 0x166   : > { %v354_v37 = vpop.xlane.xlu0 %353  ;;  %v357_v42 = vpop.xlane.xlu1 %356 }
 0x167   : > { %589 = vpow2.f32 %v562_v35  ;;  %v372_v39 = vadd.f32 %v364_v36, %v354_v37  ;;  %v373_v46 = vadd.f32 %v365_v41, %v357_v42 }
 0x168   : > { %591 = vpow2.f32 %v563_v38 }
 0x169   : > { %v582_v40 = vpop.eup %581  ;;  %v564_v47 = vmul.f32 -1.442695, %v372_v39  ;;  %v565_v51 = vmul.f32 -1.442695, %v373_v46 }
 0x16a   : > { %v584_v43 = vpop.eup %583  ;;  %v399_v44 = vadd.f32 1.0, %v582_v40 }
 0x16b   : > { %v398_v45 = vadd.f32 1.0, %v584_v43 }
 0x16c   : > { %593 = vrcp.f32 %v399_v44 }
 0x16d   : > { %v586_v48 = vpop.eup %585  ;;  %595 = vrcp.f32 %v398_v45 }
 0x16e   : > { %v588_v49 = vpop.eup %587  ;;  %597 = vpow2.f32 %v564_v47  ;;  %v401_v52 = vadd.f32 1.0, %v586_v48 }
 0x16f   : > { %v400_v50 = vadd.f32 1.0, %v588_v49 }
 0x171   : > { %599 = vrcp.f32 %v400_v50  ;;  %v590_v53 = vpop.eup %589 }
 0x172   : > { %601 = vpow2.f32 %v565_v51  ;;  %v592_v54 = vpop.eup %591  ;;  %v402_v55 = vadd.f32 1.0, %v590_v53 }
 0x173   : > { %603 = vrcp.f32 %v401_v52  ;;  %v403_v58 = vadd.f32 1.0, %v592_v54 }
 0x174   : > { %605 = vrcp.f32 %v402_v55 }
 0x175   : > { %607 = vrcp.f32 %v403_v58 }
 0x176   : > { %v594_v56 = vpop.eup %593 }
 0x177   : > { %v596_v57 = vpop.eup %595  ;;  %429 = vperm.xlu1 %580, %v594_v56  }
 0x178   : > { %424 = vperm.xlu0 %579, %v596_v57   ;;  %v598_v59 = vpop.eup %597 }
 0x179   : > { %v404_v61 = vadd.f32 1.0, %v598_v59 }
 0x17b   : > { %v600_v60 = vpop.eup %599  ;;  %609 = vrcp.f32 %v404_v61 }
 0x17c   : > { %434 = vperm.xlu1 %580, %v600_v60   ;;  %v602_v62 = vpop.eup %601 }
 0x17d   : > { %v604_v63 = vpop.eup %603  ;;  %v405_v3 = vadd.f32 1.0, %v602_v62 }
 0x17e   : > { %v606_v7 = vpop.eup %605 }
 0x17f   : > { %611 = vrcp.f32 %v405_v3  ;;  %v608_v10 = vpop.eup %607 }
 0x180   : > { %439 = vperm.xlu1 %580, %v604_v63  }
 0x184   : > { %444 = vperm.xlu1 %580, %v606_v7  }
 0x185   : > { %v610_v11 = vpop.eup %609 }
 0x188   : > { %449 = vperm.xlu1 %580, %v608_v10  }
 0x189   : > { %v612_v16 = vpop.eup %611 }
 0x18c   : > { %454 = vperm.xlu1 %580, %v610_v11  }
 0x190   : > { %459 = vperm.xlu1 %580, %v612_v16  }
 0x1f6   : > { %v430_v17 = vpop.permute.xlu1 %429 }
 0x1f7   : > { %v464_v22 = vmul.f32 %v430_v17, %v678_v5  ;;  %v465_v23 = vmul.f32 %v430_v17, %v680_v6  ;;  %v425_v24 = vpop.permute.xlu0 %424 }
 0x1f8   : > { %v462_v25 = vmul.f32 %v425_v24, %v668_v0  ;;  %v463_v26 = vmul.f32 %v425_v24, %v670_v1 }
 0x1f9   : > { %480 = vst [vmem:[%s812_s7 + $0x10] sm:$0xff] %v464_v22  ;;  %481 = vst [vmem:[%s812_s7 + $0x18] sm:$0xff] %v465_v23 }
 0x1fa   : > { %478 = vst [vmem:[%s812_s7] sm:$0xff] %v462_v25  ;;  %479 = vst [vmem:[%s812_s7 + $0x8] sm:$0xff] %v463_v26 }
 0x1fb   : > { %v435_v27 = vpop.permute.xlu1 %434 }
 0x1fc   : > { %v466_v28 = vmul.f32 %v435_v27, %v672_v2  ;;  %v467_v5 = vmul.f32 %v435_v27, %v676_v4 }
 0x1fe   : > { %482 = vst [vmem:[%s812_s7 + $0x20] sm:$0xff] %v466_v28  ;;  %483 = vst [vmem:[%s812_s7 + $0x28] sm:$0xff] %v467_v5 }
 0x1ff   : > { %v440_v6 = vpop.permute.xlu1 %439 }
 0x200   : > { %v468_v0 = vmul.f32 %v440_v6, %v684_v8  ;;  %v469_v1 = vmul.f32 %v440_v6, %v686_v9 }
 0x202   : > { %484 = vst [vmem:[%s812_s7 + $0x30] sm:$0xff] %v468_v0  ;;  %485 = vst [vmem:[%s812_s7 + $0x38] sm:$0xff] %v469_v1 }
 0x203   : > { %v445_v29 = vpop.permute.xlu1 %444 }
 0x204   : > { %v470_v30 = vmul.f32 %v445_v29, %v692_v12  ;;  %v471_v2 = vmul.f32 %v445_v29, %v694_v13 }
 0x206   : > { %486 = vst [vmem:[%s812_s7 + $0x40] sm:$0xff] %v470_v30  ;;  %487 = vst [vmem:[%s812_s7 + $0x48] sm:$0xff] %v471_v2 }
 0x207   : > { %v450_v4 = vpop.permute.xlu1 %449 }
 0x208   : > { %v472_v31 = vmul.f32 %v450_v4, %v696_v14  ;;  %v473_v8 = vmul.f32 %v450_v4, %v698_v15 }
 0x20a   : > { %488 = vst [vmem:[%s812_s7 + $0x50] sm:$0xff] %v472_v31  ;;  %489 = vst [vmem:[%s812_s7 + $0x58] sm:$0xff] %v473_v8 }
 0x20b   : > { %v455_v9 = vpop.permute.xlu1 %454 }
 0x20c   : > { %v474_v32 = vmul.f32 %v455_v9, %v704_v18  ;;  %v475_v33 = vmul.f32 %v455_v9, %v706_v19 }
 0x20e   : > { %490 = vst [vmem:[%s812_s7 + $0x60] sm:$0xff] %v474_v32  ;;  %491 = vst [vmem:[%s812_s7 + $0x68] sm:$0xff] %v475_v33 }
 0x20f   : > { %v460_v12 = vpop.permute.xlu1 %459 }
 0x210   : > { %v476_v13 = vmul.f32 %v460_v12, %v708_v20  ;;  %v477_v34 = vmul.f32 %v460_v12, %v710_v21 }
 0x212   : > { %492 = vst [vmem:[%s812_s7 + $0x70] sm:$0xff] %v476_v13  ;;  %493 = vst [vmem:[%s812_s7 + $0x78] sm:$0xff] %v477_v34 }
 0x213 PF: > { %s15_s18 = sadd.s32 1, %s619_s18  }
 0x214   : > { %p12_p4 = scmp.ge.s32.totalorder %s15_s18, 4  }
 0x216   :  { %14 = sbr.rel (!%p12_p4) target bundleno = 1 (0x1), region = 70 }

</bundles_post_ra>
